<compile_context>
chip_gen: v7x
topology: tpu7x:2x2x1
jax: 0.10.0
libtpu: 0.0.40
codegen_flags: <defaults>
</compile_context>

<pallas_src>
import jax
import jax.numpy as jnp
from jax.experimental import pallas as pl
from jax.experimental.pallas import tpu as pltpu

LANE = 128
SUBLANE = 8


def _cdiv(a, b):
    return -(-a // b)


def _round_up(x, m):
    return _cdiv(x, m) * m


def actor_kernel(x_ref, w1_ref, b1_ref, w2_ref, b2_ref, w3_ref, b3_ref, out_ref):
    """One batch tile: 3 x (matmul on MXU, f32 accumulation) + ReLU/ReLU/tanh."""
    wdt = w1_ref.dtype  # compute dtype for the MXU operands (f32 or bf16)

    x = x_ref[...].astype(wdt)

    # Layer 1: Linear + ReLU  (bias add in f32)
    h1 = jnp.dot(x, w1_ref[...], preferred_element_type=jnp.float32) + b1_ref[...]
    h1 = jnp.maximum(h1, 0.0).astype(wdt)

    # Layer 2: Linear + ReLU
    h2 = jnp.dot(h1, w2_ref[...], preferred_element_type=jnp.float32) + b2_ref[...]
    h2 = jnp.maximum(h2, 0.0).astype(wdt)

    # Layer 3: Linear + tanh (tanh on the EUP, f32); unpadded (tm, action_dim)
    # output block -> minimal, contiguous HBM writeback per tile.
    o = jnp.dot(h2, w3_ref[...], preferred_element_type=jnp.float32) + b3_ref[...]
    out_ref[...] = jnp.tanh(o)


def actor_forward(obs, params, *, tm_max=2048, compute_dtype=jnp.bfloat16):
    """obs: (B, obs_dim) f32. params: dict of w1,b1,w2,b2,w3,b3 ((in,out) weights).

    compute_dtype: dtype fed to the MXU (bf16 recommended on every TPU
    generation; f32 keeps strict parity with the fp32 PyTorch forward).
    Accumulation is always f32.  tm_max caps the batch-tile size; the actual
    tile is chosen adaptively so batch padding is minimal and the grid has
    enough steps to feed both TensorCores on v7x.
    """
    w1 = params["w1"].astype(compute_dtype)
    w2 = params["w2"].astype(compute_dtype)
    w3 = params["w3"].astype(compute_dtype)
    b1 = params["b1"].astype(jnp.float32)
    b2 = params["b2"].astype(jnp.float32)
    b3 = params["b3"].astype(jnp.float32)

    B, obs_dim = obs.shape
    hid1 = params["w1"].shape[1]
    hid2 = params["w2"].shape[1]
    action_dim = params["w3"].shape[1]

    # --- adaptive batch tiling -------------------------------------------------
    # At least 4 grid steps when B allows it (>=2 per TensorCore on v7x, and
    # enough steps for double-buffered obs/out DMA pipelining); tile rounded to
    # the 8-row sublane granule so batch padding is at most tm-1 < tm_max rows
    # and typically <8 rows.
    MIN_TILES = 4
    num_tiles = max(_cdiv(B, tm_max), min(MIN_TILES, _cdiv(B, SUBLANE)))
    tm = _round_up(_cdiv(B, num_tiles), SUBLANE)
    b_pad = _round_up(B, tm)
    if b_pad != B:
        obs = jnp.pad(obs, ((0, b_pad - B), (0, 0)))
    grid = (b_pad // tm,)

    # Weights/biases: constant index_map -> DMA'd once, kept VMEM-resident.
    def const(arr):
        return pl.BlockSpec(arr.shape, lambda i: (0,) * arr.ndim)

    weight_bytes = sum(int(a.size) * a.dtype.itemsize
                       for a in (w1, b1, w2, b2, w3, b3))
    cost = pl.CostEstimate(
        flops=2 * b_pad * (obs_dim * hid1 + hid1 * hid2 + hid2 * action_dim),
        transcendentals=b_pad * action_dim,  # tanh per output element
        bytes_accessed=(b_pad * obs_dim * obs.dtype.itemsize   # obs read
                        + b_pad * action_dim * 4               # f32 output write
                        + weight_bytes),
    )

    out = pl.pallas_call(
        actor_kernel,
        out_shape=jax.ShapeDtypeStruct((b_pad, action_dim), jnp.float32),
        grid=grid,
        in_specs=[
            pl.BlockSpec((tm, obs_dim), lambda i: (i, 0)),  # obs tile, pipelined
            const(w1), const(b1),
            const(w2), const(b2),
            const(w3), const(b3),
        ],
        out_specs=pl.BlockSpec((tm, action_dim), lambda i: (i, 0)),
        compiler_params=pltpu.CompilerParams(
            # Batch tiles are independent -> shard across v7x's 2 TensorCores.
            dimension_semantics=("parallel",),
        ),
        cost_estimate=cost,
    )(obs, w1, b1, w2, b2, w3, b3)

    return out[:B]


def actor_reference(obs, params, compute_dtype=jnp.float32):
    """Pure-JAX reference mirroring the kernel math (same casts)."""
    wdt = compute_dtype
    w1, w2, w3 = (params[k].astype(wdt) for k in ("w1", "w2", "w3"))
    b1, b2, b3 = (params[k].astype(jnp.float32) for k in ("b1", "b2", "b3"))
    x = obs.astype(wdt)
    h1 = jnp.maximum(jnp.dot(x, w1, preferred_element_type=jnp.float32) + b1, 0.0)
    h1 = h1.astype(wdt)
    h2 = jnp.maximum(jnp.dot(h1, w2, preferred_element_type=jnp.float32) + b2, 0.0)
    h2 = h2.astype(wdt)
    return jnp.tanh(jnp.dot(h2, w3, preferred_element_type=jnp.float32) + b3)


def init_actor_params(key, obs_dim, action_dim, hidden_1=128, hidden_2=128,
                      pixel_case=False):
    """Deterministic init mirroring other_net_init / final_net_init.

    other_net_init: limit = 1 / sqrt(weight.size(0)) = 1 / sqrt(out_features)
    final_net_init: uniform(-0.003, 0.003) (or +-0.0003 for pixel_case)
    Weights are produced directly in (in, out) layout.
    """
    k = jax.random.split(key, 6)
    lim1 = 1.0 / (hidden_1 ** 0.5)
    lim2 = 1.0 / (hidden_2 ** 0.5)
    lim3 = 0.0003 if pixel_case else 0.003
    return {
        "w1": jax.random.uniform(k[0], (obs_dim, hidden_1), jnp.float32, -lim1, lim1),
        "b1": jax.random.uniform(k[1], (1, hidden_1), jnp.float32, -lim1, lim1),
        "w2": jax.random.uniform(k[2], (hidden_1, hidden_2), jnp.float32, -lim2, lim2),
        "b2": jax.random.uniform(k[3], (1, hidden_2), jnp.float32, -lim2, lim2),
        "w3": jax.random.uniform(k[4], (hidden_2, action_dim), jnp.float32, -lim3, lim3),
        "b3": jax.random.uniform(k[5], (1, action_dim), jnp.float32, -lim3, lim3),
    }


if __name__ == "__main__":
    key = jax.random.PRNGKey(0)
    kp, kx = jax.random.split(key)

    # Small shapes consistent with the module: obs_dim=16, action_dim=4, hidden=128
    batch, obs_dim, action_dim = 8, 16, 4
    params = init_actor_params(kp, obs_dim, action_dim, hidden_1=128, hidden_2=128)
    obs = jax.random.normal(kx, (batch, obs_dim), jnp.float32)

    # --- f32 path: strict parity with the fp32 PyTorch forward ---------------
    out_f32 = jax.block_until_ready(
        actor_forward(obs, params, compute_dtype=jnp.float32))
    ref_f32 = actor_reference(obs, params, jnp.float32)
    assert out_f32.shape == (batch, action_dim)
    assert jnp.allclose(out_f32, ref_f32, atol=1e-4), "f32 mismatch vs reference"

    # --- bf16-weight path (default; MXU-native on all generations) ------------
    out_bf16 = jax.block_until_ready(
        actor_forward(obs, params, compute_dtype=jnp.bfloat16))
    ref_bf16 = actor_reference(obs, params, jnp.bfloat16)
    assert jnp.allclose(out_bf16, ref_bf16, atol=5e-3), "bf16 mismatch vs bf16 ref"
    assert jnp.allclose(out_bf16, ref_f32, atol=3e-2), "bf16 drifted too far from f32"

    # --- larger, non-tile-aligned batch: exercises adaptive tiling + padding --
    big_obs = jax.random.normal(jax.random.PRNGKey(1), (1000, obs_dim), jnp.float32)
    out_big = jax.block_until_ready(
        actor_forward(big_obs, params, tm_max=512, compute_dtype=jnp.float32))
    ref_big = actor_reference(big_obs, params, jnp.float32)
    assert out_big.shape == (1000, action_dim)
    assert jnp.allclose(out_big, ref_big, atol=1e-4), "big-batch mismatch vs reference"

    # --- very large batch: tm_max=2048 default, multi-tile grid ---------------
    huge_obs = jax.random.normal(jax.random.PRNGKey(2), (4100, obs_dim), jnp.float32)
    out_huge = jax.block_until_ready(actor_forward(huge_obs, params))
    ref_huge = actor_reference(huge_obs, params, jnp.bfloat16)
    assert out_huge.shape == (4100, action_dim)
    assert jnp.allclose(out_huge, ref_huge, atol=5e-3), "huge-batch mismatch vs reference"

    print("KERNEL_OK")
</pallas_src>

<mosaic_0001>
module attributes {stable_mosaic.version = 11 : i64} {
  func.func @actor_kernel(%arg0: i32, %arg1: memref<8x16xf32, #tpu.memory_space<vmem>>, %arg2: memref<16x128xf32, #tpu.memory_space<vmem>>, %arg3: memref<1x128xf32, #tpu.memory_space<vmem>>, %arg4: memref<128x128xf32, #tpu.memory_space<vmem>>, %arg5: memref<1x128xf32, #tpu.memory_space<vmem>>, %arg6: memref<128x4xf32, #tpu.memory_space<vmem>>, %arg7: memref<1x4xf32, #tpu.memory_space<vmem>>, %arg8: memref<8x4xf32, #tpu.memory_space<vmem>>) attributes {dimension_semantics = [#tpu.dimension_semantics<parallel>], iteration_bounds = array<i64: 1>, scalar_prefetch = 0 : i64, scratch_operands = 0 : i64, tpu.core_type = #tpu.core_type<tc>, window_params = [{transform_indices = @transform_0, window_bounds = array<i64: 8, 16>}, {pipeline_mode = #tpu.pipeline_mode<synchronous>, transform_indices = @transform_1, window_bounds = array<i64: 16, 128>}, {pipeline_mode = #tpu.pipeline_mode<synchronous>, transform_indices = @transform_2, window_bounds = array<i64: 1, 128>}, {pipeline_mode = #tpu.pipeline_mode<synchronous>, transform_indices = @transform_3, window_bounds = array<i64: 128, 128>}, {pipeline_mode = #tpu.pipeline_mode<synchronous>, transform_indices = @transform_4, window_bounds = array<i64: 1, 128>}, {pipeline_mode = #tpu.pipeline_mode<synchronous>, transform_indices = @transform_5, window_bounds = array<i64: 128, 4>}, {pipeline_mode = #tpu.pipeline_mode<synchronous>, transform_indices = @transform_6, window_bounds = array<i64: 1, 4>}, {transform_indices = @transform_7, window_bounds = array<i64: 8, 4>}]} {
    %c0 = arith.constant 0 : index
    %c0_0 = arith.constant 0 : index
    %0 = vector.load %arg1[%c0, %c0_0] : memref<8x16xf32, #tpu.memory_space<vmem>>, vector<8x16xf32>
    %c0_1 = arith.constant 0 : index
    %c0_2 = arith.constant 0 : index
    %1 = vector.load %arg2[%c0_1, %c0_2] : memref<16x128xf32, #tpu.memory_space<vmem>>, vector<16x128xf32>
    %cst = arith.constant dense<0.000000e+00> : vector<8x128xf32>
    %2 = tpu.matmul %0, %1, %cst {dimension_numbers = #tpu.dot_dimension_numbers<[1], [0], [0], [1], [0, 0, 1, 1], [], []>} : vector<8x16xf32>, vector<16x128xf32>, vector<8x128xf32> -> vector<8x128xf32>
    %c0_3 = arith.constant 0 : index
    %c0_4 = arith.constant 0 : index
    %3 = vector.load %arg3[%c0_3, %c0_4] : memref<1x128xf32, #tpu.memory_space<vmem>>, vector<1x128xf32>
    %4 = vector.broadcast %3 : vector<1x128xf32> to vector<8x128xf32>
    %5 = arith.addf %2, %4 : vector<8x128xf32>
    %cst_5 = arith.constant 0.000000e+00 : f32
    %6 = vector.broadcast %cst_5 : f32 to vector<8x128xf32>
    %7 = arith.maximumf %5, %6 : vector<8x128xf32>
    %c0_6 = arith.constant 0 : index
    %c0_7 = arith.constant 0 : index
    %8 = vector.load %arg4[%c0_6, %c0_7] : memref<128x128xf32, #tpu.memory_space<vmem>>, vector<128x128xf32>
    %cst_8 = arith.constant dense<0.000000e+00> : vector<8x128xf32>
    %9 = tpu.matmul %7, %8, %cst_8 {dimension_numbers = #tpu.dot_dimension_numbers<[1], [0], [0], [1], [0, 0, 1, 1], [], []>} : vector<8x128xf32>, vector<128x128xf32>, vector<8x128xf32> -> vector<8x128xf32>
    %c0_9 = arith.constant 0 : index
    %c0_10 = arith.constant 0 : index
    %10 = vector.load %arg5[%c0_9, %c0_10] : memref<1x128xf32, #tpu.memory_space<vmem>>, vector<1x128xf32>
    %11 = vector.broadcast %10 : vector<1x128xf32> to vector<8x128xf32>
    %12 = arith.addf %9, %11 : vector<8x128xf32>
    %cst_11 = arith.constant 0.000000e+00 : f32
    %13 = vector.broadcast %cst_11 : f32 to vector<8x128xf32>
    %14 = arith.maximumf %12, %13 : vector<8x128xf32>
    %c0_12 = arith.constant 0 : index
    %c0_13 = arith.constant 0 : index
    %15 = vector.load %arg6[%c0_12, %c0_13] : memref<128x4xf32, #tpu.memory_space<vmem>>, vector<128x4xf32>
    %cst_14 = arith.constant dense<0.000000e+00> : vector<8x4xf32>
    %16 = tpu.matmul %14, %15, %cst_14 {dimension_numbers = #tpu.dot_dimension_numbers<[1], [0], [0], [1], [0, 0, 1, 1], [], []>} : vector<8x128xf32>, vector<128x4xf32>, vector<8x4xf32> -> vector<8x4xf32>
    %c0_15 = arith.constant 0 : index
    %c0_16 = arith.constant 0 : index
    %17 = vector.load %arg7[%c0_15, %c0_16] : memref<1x4xf32, #tpu.memory_space<vmem>>, vector<1x4xf32>
    %18 = vector.broadcast %17 : vector<1x4xf32> to vector<8x4xf32>
    %19 = arith.addf %16, %18 : vector<8x4xf32>
    %20 = math.tanh %19 : vector<8x4xf32>
    %c0_17 = arith.constant 0 : index
    %c0_18 = arith.constant 0 : index
    %21 = vector.load %arg8[%c0_17, %c0_18] : memref<8x4xf32, #tpu.memory_space<vmem>>, vector<8x4xf32>
    tpu.vector_store %arg8[%c0_17, %c0_18], %20 {strides = array<i32>} : memref<8x4xf32, #tpu.memory_space<vmem>>, vector<8x4xf32>,
    return
  }
  func.func @transform_0(%arg0: i32) -> (i32, i32) {
    %c0_i32 = arith.constant 0 : i32
    %c0_i32_0 = arith.constant 0 : i32
    return %arg0, %c0_i32 : i32, i32
  }
  func.func @transform_1(%arg0: i32) -> (i32, i32) {
    %c0_i32 = arith.constant 0 : i32
    %c0_i32_0 = arith.constant 0 : i32
    %c0_i32_1 = arith.constant 0 : i32
    return %c0_i32, %c0_i32_0 : i32, i32
  }
  func.func @transform_2(%arg0: i32) -> (i32, i32) {
    %c0_i32 = arith.constant 0 : i32
    %c0_i32_0 = arith.constant 0 : i32
    %c0_i32_1 = arith.constant 0 : i32
    return %c0_i32, %c0_i32_0 : i32, i32
  }
  func.func @transform_3(%arg0: i32) -> (i32, i32) {
    %c0_i32 = arith.constant 0 : i32
    %c0_i32_0 = arith.constant 0 : i32
    %c0_i32_1 = arith.constant 0 : i32
    return %c0_i32, %c0_i32_0 : i32, i32
  }
  func.func @transform_4(%arg0: i32) -> (i32, i32) {
    %c0_i32 = arith.constant 0 : i32
    %c0_i32_0 = arith.constant 0 : i32
    %c0_i32_1 = arith.constant 0 : i32
    return %c0_i32, %c0_i32_0 : i32, i32
  }
  func.func @transform_5(%arg0: i32) -> (i32, i32) {
    %c0_i32 = arith.constant 0 : i32
    %c0_i32_0 = arith.constant 0 : i32
    %c0_i32_1 = arith.constant 0 : i32
    return %c0_i32, %c0_i32_0 : i32, i32
  }
  func.func @transform_6(%arg0: i32) -> (i32, i32) {
    %c0_i32 = arith.constant 0 : i32
    %c0_i32_0 = arith.constant 0 : i32
    %c0_i32_1 = arith.constant 0 : i32
    return %c0_i32, %c0_i32_0 : i32, i32
  }
  func.func @transform_7(%arg0: i32) -> (i32, i32) {
    %c0_i32 = arith.constant 0 : i32
    %c0_i32_0 = arith.constant 0 : i32
    return %arg0, %c0_i32 : i32, i32
  }
}

</mosaic_0001>

<bundles_post_ra>
// kernel: tpu_custom_call.1
= control target key start
LH: loop header
LB: loop body
LE: loop exit
PB: predicated region body
PF: predicated region fallthrough
CT: control target
= control target key end

     0   :  { %12 = vsyncpa [#allocation3], 0  ;;  %s521_s24 = smov [#allocation2]   ;;  %s710_s0 = inlined_call_operand.vmem [shape: f32[8,16], index: 0, kind: input, shape index: {}]   ;;  %s711_s1 = inlined_call_operand.hbm [shape: f32[16,128], index: 1, kind: input, shape index: {}]   ;;  %s712_s2 = inlined_call_operand.vmem [shape: f32[1,128], index: 2, kind: input, shape index: {}]   ;;  %s713_s3 = inlined_call_operand.vmem [shape: f32[128,128], index: 3, kind: input, shape index: {}]   ;;  %s714_s4 = inlined_call_operand.vmem [shape: f32[1,128], index: 4, kind: input, shape index: {}]   ;;  %s715_s5 = inlined_call_operand.vmem [shape: f32[128,4], index: 5, kind: input, shape index: {}]   ;;  %s716_s6 = inlined_call_operand.vmem [shape: f32[1,4], index: 6, kind: input, shape index: {}]   ;;  %s717_s7 = inlined_call_operand.vmem [shape: f32[8,4], index: 7, kind: output, shape index: {}]  }
   0x1   :  { %s20_s25 = sshll.u32 %s521_s24, 4  ;;  %s497_s28 = scalar_lea.hbm %s711_s1, 256  ;;  %s21_s25 = int_to_ptr.vmem [resolvable:$true] %s20_s25 }
   0x2   :  { %p498_p0 = scmp.ne.s32.totalorder %s711_s1, %s497_s28  ;;  %p501_p1 = scmp.lt.u32.totalorder %s497_s28, %s711_s1 }
   0x4   :  { %p503_p2 = pnand %p501_p1, %p498_p0 }
   0x6   :  { %506 = shalt.err (!%p503_p2)
}
   0x7   :  { %s507_s10 = scalar_lea.vmem %s21_s25, 256  ;;  %p512_p4 = scmp.lt.s32.totalorder %s21_s25, %s21_s25 }
   0x8   :  { %p508_p3 = scmp.ne.s32.totalorder %s21_s25, %s507_s10  ;;  %p513_p5 = scmp.lt.s32.totalorder %s507_s10, %s507_s10 }
   0xa   :  { %p514_p6 = por %p513_p5, %p512_p4 }
   0xc   :  { %p515_p7 = pnand %p514_p6, %p508_p3 }
   0xe   :  { %518 = shalt.err (!%p515_p7)
}
   0xf   :  { %s522_s11 = smov 128   ;;  %s523_s12 = smov 8  }
  0x10   :  { %26 = dma.hbm_to_vmem [thread:$0]  %s711_s1, 256, %s21_s25, [#allocation3], %s522_s11, %s522_s11, %s523_s12  }
  0x11   :  { %519 = dma.done.wait [#allocation3], 256  }
  0x12   :  { %520 = vsyncadd [#allocation3], 4294967040  ;;  %v524_v0 = vmov 0.0|0.0   ;;  %vm525_vm0 = vmmov 0   ;;  %v526_v1 = vmov 0.0   ;;  %v41_v2 = vld [vmem:[#allocation2] sm:$0xff] }
  0x13   :  { %438 = vmatprep.subr.bf16.mxu0 %v524_v0  ;;  %365 = vmatprep.mubr.msk.f32.mxu0 %vm525_vm0, %v526_v1  ;;  %v42_v3 = vld [vmem:[#allocation2 + $0x8] sm:$0xff]  ;;  %v125_v5 = vld [vmem:[%s713_s3] sm:$0xff]  ;;  %v127_v7 = vld [vmem:[%s713_s3 + $0x10] sm:$0xff]  ;;  %vm50_vm1 = vcmask 130048   ;;  %vm313_vm2 = vcmask 31744  }
  0x14   :  { %441 = vmatprep.subr.bf16.mxu1 %v524_v0  ;;  %400 = vmatprep.mubr.msk.f32.mxu1 %vm525_vm0, %v526_v1  ;;  %v439_v4 = vpack.c.bf16 %v42_v3, %v41_v2  ;;  %v126_v6 = vld [vmem:[%s713_s3 + $0x8] sm:$0xff]  ;;  %v128_v9 = vld [vmem:[%s713_s3 + $0x18] sm:$0xff]  ;;  %v40_v10 = vld [vmem:[%s710_s0] sm:$0xff] }
  0x15   :  { %v442_v8 = vpack.c.bf16 %v126_v6, %v125_v5  ;;  %v445_v11 = vpack.c.bf16 %v128_v9, %v127_v7  ;;  %v129_v12 = vld [vmem:[%s713_s3 + $0x20] sm:$0xff]  ;;  %v130_v13 = vld [vmem:[%s713_s3 + $0x28] sm:$0xff]  ;;  %v131_v15 = vld [vmem:[%s713_s3 + $0x30] sm:$0xff] }
  0x16   :  { %440 = vmatpush3.bf16.msra.mxu0 %v439_v4  ;;  %v448_v14 = vpack.c.bf16 %v130_v13, %v129_v12  ;;  %v132_v16 = vld [vmem:[%s713_s3 + $0x38] sm:$0xff]  ;;  %v133_v18 = vld [vmem:[%s713_s3 + $0x40] sm:$0xff]  ;;  %v134_v19 = vld [vmem:[%s713_s3 + $0x48] sm:$0xff] }
  0x17   :  { %443 = vmatpush3.bf16.msra.mxu1 %v442_v8  ;;  %465 = vmatprep.subr.bf16.mxu0 %v524_v0  ;;  %v451_v17 = vpack.c.bf16 %v132_v16, %v131_v15  ;;  %v454_v20 = vpack.c.bf16 %v134_v19, %v133_v18  ;;  %v135_v21 = vld [vmem:[%s713_s3 + $0x50] sm:$0xff]  ;;  %v136_v22 = vld [vmem:[%s713_s3 + $0x58] sm:$0xff]  ;;  %v137_v24 = vld [vmem:[%s713_s3 + $0x60] sm:$0xff] }
  0x18   :  { %444 = vmatprep.subr.bf16.mxu1 %v524_v0  ;;  %v457_v23 = vpack.c.bf16 %v136_v22, %v135_v21  ;;  %v138_v25 = vld [vmem:[%s713_s3 + $0x68] sm:$0xff]  ;;  %v139_v27 = vld [vmem:[%s713_s3 + $0x70] sm:$0xff]  ;;  %v140_v28 = vld [vmem:[%s713_s3 + $0x78] sm:$0xff] }
  0x19   :  { %366 = vmatmul.mubr.msk.f32.vlgmr.msra.gmra.mrb[0].mxu0 %vm50_vm1, %v40_v10  ;;  %v460_v26 = vpack.c.bf16 %v138_v25, %v137_v24  ;;  %v463_v29 = vpack.c.bf16 %v140_v28, %v139_v27  ;;  %v219_v30 = vld [vmem:[%s715_s5] sm:$0xff]  ;;  %v220_v31 = vld [vmem:[%s715_s5 + $0x8] sm:$0xff]  ;;  %v221_v32 = vld [vmem:[%s715_s5 + $0x10] sm:$0xff] }
  0x1a   :  { %435 = vmatprep.mubr.msk.f32.mxu0 %vm525_vm0, %v526_v1  ;;  %v466_v33 = vpack.c.bf16 %v220_v31, %v219_v30  ;;  %v222_v34 = vld [vmem:[%s715_s5 + $0x18] sm:$0xff]  ;;  %v223_v36 = vld [vmem:[%s715_s5 + $0x20] sm:$0xff]  ;;  %v224_v37 = vld [vmem:[%s715_s5 + $0x28] sm:$0xff] }
  0x1b   :  { %446 = vmatpush3.bf16.msra.mxu1 %v445_v11  ;;  %v469_v35 = vpack.c.bf16 %v222_v34, %v221_v32  ;;  %v472_v38 = vpack.c.bf16 %v224_v37, %v223_v36  ;;  %v225_v39 = vld [vmem:[%s715_s5 + $0x30] sm:$0xff]  ;;  %v226_v40 = vld [vmem:[%s715_s5 + $0x38] sm:$0xff]  ;;  %v227_v42 = vld [vmem:[%s715_s5 + $0x40] sm:$0xff] }
  0x1c   :  { %447 = vmatprep.subr.bf16.mxu1 %v524_v0  ;;  %467 = vmatpush3.bf16.msra.mxu0 %v466_v33  ;;  %v475_v41 = vpack.c.bf16 %v226_v40, %v225_v39  ;;  %v228_v43 = vld [vmem:[%s715_s5 + $0x48] sm:$0xff]  ;;  %v229_v45 = vld [vmem:[%s715_s5 + $0x50] sm:$0xff]  ;;  %v230_v46 = vld [vmem:[%s715_s5 + $0x58] sm:$0xff] }
  0x1d   :  { %468 = vmatprep.subr.bf16.mxu0 %v524_v0  ;;  %v478_v44 = vpack.c.bf16 %v228_v43, %v227_v42  ;;  %v481_v47 = vpack.c.bf16 %v230_v46, %v229_v45  ;;  %v231_v48 = vld [vmem:[%s715_s5 + $0x60] sm:$0xff]  ;;  %v232_v49 = vld [vmem:[%s715_s5 + $0x68] sm:$0xff]  ;;  %v233_v56 = vld [vmem:[%s715_s5 + $0x70] sm:$0xff] }
  0x1e   :  { %v484_v50 = vpack.c.bf16 %v232_v49, %v231_v48  ;;  %v320_v51 = vld [vmem:[%s712_s2] ss:$0 sm:$0xff]  ;;  %v234_v57 = vld [vmem:[%s715_s5 + $0x78] sm:$0xff] }
  0x1f   :  { %449 = vmatpush3.bf16.msra.mxu1 %v448_v14  ;;  %v487_v58 = vpack.c.bf16 %v234_v57, %v233_v56  ;;  %v322_v59 = vld [vmem:[%s714_s4] ss:$0 sm:$0xff] }
  0x20   :  { %450 = vmatprep.subr.bf16.mxu1 %v524_v0  ;;  %470 = vmatpush3.bf16.msra.mxu0 %v469_v35 }
  0x21   :  { %471 = vmatprep.subr.bf16.mxu0 %v524_v0 }
  0x23   :  { %452 = vmatpush3.bf16.msra.mxu1 %v451_v17 }
  0x24   :  { %453 = vmatprep.subr.bf16.mxu1 %v524_v0  ;;  %473 = vmatpush3.bf16.msra.mxu0 %v472_v38 }
  0x25   :  { %474 = vmatprep.subr.bf16.mxu0 %v524_v0 }
  0x27   :  { %455 = vmatpush3.bf16.msra.mxu1 %v454_v20 }
  0x28   :  { %456 = vmatprep.subr.bf16.mxu1 %v524_v0  ;;  %476 = vmatpush3.bf16.msra.mxu0 %v475_v41 }
  0x29   :  { %477 = vmatprep.subr.bf16.mxu0 %v524_v0 }
  0x2b   :  { %458 = vmatpush3.bf16.msra.mxu1 %v457_v23 }
  0x2c   :  { %459 = vmatprep.subr.bf16.mxu1 %v524_v0  ;;  %479 = vmatpush3.bf16.msra.mxu0 %v478_v44 }
  0x2d   :  { %480 = vmatprep.subr.bf16.mxu0 %v524_v0 }
  0x2f   :  { %461 = vmatpush3.bf16.msra.mxu1 %v460_v26 }
  0x30   :  { %462 = vmatprep.subr.bf16.mxu1 %v524_v0  ;;  %482 = vmatpush3.bf16.msra.mxu0 %v481_v47 }
  0x31   :  { %483 = vmatprep.subr.bf16.mxu0 %v524_v0 }
  0x33   :  { %464 = vmatpush3.bf16.msra.mxu1 %v463_v29 }
  0x34   :  { %485 = vmatpush3.bf16.msra.mxu0 %v484_v50 }
  0x35   :  { %486 = vmatprep.subr.bf16.mxu0 %v524_v0  ;;  %v323_v0 = vld [vmem:[%s716_s6] ss:$0 sm:$0xff] }
  0x38   :  { %488 = vmatpush3.bf16.msra.mxu0 %v487_v58 }
  0xec   :  { %v120_v52 = vpop.f32.mrb[0].mxu0 }
  0xed   :  { %v121_v53 = vadd.f32 %v320_v51, %v120_v52  ;;  %v367_v54 = vpop.f32.mrb[1].mxu0 }
  0xef   :  { %v124_v55 = vmax.f32 %v121_v53, 0.0 }
  0xf1   :  { %401 = vmatmul.mubr.f32.vlgmr.msra.gmra.mrb[0].mxu1 %v124_v55 }
 0x1c4   :  { %v214_v60 = vpop.f32.mrb[0].mxu1 }
 0x1c5   :  { %v215_v61 = vadd.f32 %v322_v59, %v214_v60  ;;  %v402_v62 = vpop.f32.mrb[1].mxu1 }
 0x1c7   :  { %v218_v63 = vmax.f32 %v215_v61, 0.0 }
 0x1c9   :  { %436 = vmatmul.mubr.f32.vlgmr.msra.gmra.mrb[2].mxu0 %v218_v63 }
 0x29c   :  { %v308_v1 = vpop.f32.mrb[2].mxu0 }
 0x29d   :  { %v309_v2 = vadd.f32 %v323_v0, %v308_v1  ;;  %v437_v3 = vpop.f32.mrb[3].mxu0 }
 0x29f   :  { %495 = vtanh.f32 %v309_v2 }
 0x2a9   :  { %v496_v4 = vpop.eup %495 }
 0x2aa   :  { %314 = vst.msk [vmem:[%s717_s7] sm:$0xff] %vm313_vm2, %v496_v4 }
 0x2ab   :  { %319 = vsyncpa [#allocation3], 1 }

</bundles_post_ra>
